<compile_context>
chip_gen: v7x
topology: tpu7x:2x2x1
jax: 0.10.0
libtpu: 0.0.40
codegen_flags: <defaults>
</compile_context>

<pallas_src>
import functools

import jax
import jax.numpy as jnp
from jax import lax
from jax.experimental import pallas as pl
from jax.experimental.pallas import tpu as pltpu


def msa_kernel(x_ref, w_qkv_ref, b_qkv_ref, w_out_ref, b_out_ref, o_ref,
               ctx_ref, *, heads, scale, compute_dtype):
    """One grid step = one batch element, all heads.

    x_ref     : (1, N, E)   compute_dtype
    w_qkv_ref : (E, 3E)     compute_dtype   (3E axis packed [3][H][hd])
    b_qkv_ref : (1, 3E)     f32
    w_out_ref : (E, E)      compute_dtype
    b_out_ref : (1, E)      f32
    o_ref     : (1, N, E)   out dtype
    ctx_ref   : (N, E)      f32 scratch (per-head context slabs)
    """
    E3 = w_qkv_ref.shape[1]
    E = E3 // 3
    hd = E // heads
    approx = compute_dtype != jnp.float32

    x = x_ref[0]                                                    # (N, E)

    # Fused Q/K/V projection: one lane-dense MXU pass, f32 accumulation.
    qkv = jnp.dot(x, w_qkv_ref[...],
                  preferred_element_type=jnp.float32) + b_qkv_ref[...]  # (N,3E)

    # TODO(synk): group heads so the slab stores below land on 128-lane
    # boundaries, and switch to lax.fori_loop for large H to bound live ranges.
    for h in range(heads):
        # Fold the 1/sqrt(hd) scale into q (N*hd mults instead of N*N).
        q = qkv[:, h * hd:(h + 1) * hd] * scale                     # (N, hd)
        k = qkv[:, E + h * hd:E + (h + 1) * hd]                     # (N, hd)
        v = qkv[:, 2 * E + h * hd:2 * E + (h + 1) * hd]             # (N, hd)

        # scores_ij = sum_d q_id * k_jd -- contract last dims, no transpose.
        s = lax.dot_general(
            q.astype(compute_dtype), k.astype(compute_dtype),
            dimension_numbers=(((1,), (1,)), ((), ())),
            preferred_element_type=jnp.float32)                     # (N, N)

        # Numerically stable softmax, normalization deferred past P @ V.
        s = s - jnp.max(s, axis=-1, keepdims=True)
        p = jnp.exp(s)
        inv_l = pl.reciprocal(jnp.sum(p, axis=-1, keepdims=True), approx=approx)

        ctx = jnp.dot(p.astype(compute_dtype), v.astype(compute_dtype),
                      preferred_element_type=jnp.float32) * inv_l   # (N, hd)

        # Store this head's context into its column slab of the (N, E) scratch.
        ctx_ref[:, h * hd:(h + 1) * hd] = ctx

    # One full-contraction-depth output projection for all heads at once.
    out = jnp.dot(ctx_ref[...].astype(compute_dtype), w_out_ref[...],
                  preferred_element_type=jnp.float32) + b_out_ref[...]
    o_ref[0] = out.astype(o_ref.dtype)


def msa_forward(x, w_qkv, b_qkv, w_out, b_out, *, heads,
                compute_dtype=jnp.float32):
    """x: (B, N, E). Weights stored (in, out) so y = x @ W + b.

    The 3E axis of w_qkv / b_qkv is packed [3][H][hd] (matches torch's
    .view(B, N, 3, H, hd) followed by chunk over dim 2).
    """
    B, N, E = x.shape
    hd = E // heads
    scale = 1.0 / (hd ** 0.5)
    out_dtype = x.dtype

    # Only cast x when needed (a standalone cast is an extra HBM pass).
    x_c = x if x.dtype == compute_dtype else x.astype(compute_dtype)
    w_qkv_c = w_qkv.astype(compute_dtype)
    w_out_c = w_out.astype(compute_dtype)
    b_qkv_f = b_qkv.astype(jnp.float32)
    b_out_f = b_out.astype(jnp.float32)

    kernel = functools.partial(msa_kernel, heads=heads, scale=scale,
                               compute_dtype=compute_dtype)

    return pl.pallas_call(
        kernel,
        out_shape=jax.ShapeDtypeStruct((B, N, E), out_dtype),
        grid=(B,),
        in_specs=[
            pl.BlockSpec((1, N, E), lambda b: (b, 0, 0)),      # x (streams)
            pl.BlockSpec((E, 3 * E), lambda b: (0, 0)),        # W_qkv (resident)
            pl.BlockSpec((1, 3 * E), lambda b: (0, 0)),        # b_qkv (resident)
            pl.BlockSpec((E, E), lambda b: (0, 0)),            # W_out (resident)
            pl.BlockSpec((1, E), lambda b: (0, 0)),            # b_out (resident)
        ],
        out_specs=pl.BlockSpec((1, N, E), lambda b: (b, 0, 0)),
        scratch_shapes=[pltpu.VMEM((N, E), jnp.float32)],
        compiler_params=pltpu.CompilerParams(
            dimension_semantics=("parallel",)),
    )(x_c, w_qkv_c, b_qkv_f, w_out_c, b_out_f)


def msa_reference(x, w_qkv, b_qkv, w_out, b_out, *, heads):
    """Pure-JAX reference mirroring the PyTorch forward exactly."""
    B, N, E = x.shape
    hd = E // heads
    qkv = x @ w_qkv + b_qkv[0]                                   # (B, N, 3E)
    qkv = qkv.reshape(B, N, 3, heads, hd)
    q, k, v = qkv[:, :, 0], qkv[:, :, 1], qkv[:, :, 2]           # (B, N, H, hd)
    scores = jnp.einsum('bihd,bjhd->bhij', q, k) / (hd ** 0.5)
    attn = jax.nn.softmax(scores, axis=-1)
    msa = jnp.einsum('bhij,bjhd->bihd', attn, v).reshape(B, N, E)
    return msa @ w_out + b_out[0]


if __name__ == "__main__":
    # Small, module-consistent shapes.
    B, N, E, heads = 2, 8, 32, 4

    key = jax.random.PRNGKey(0)
    kx, k1, k2, k3, k4 = jax.random.split(key, 5)

    x = jax.random.normal(kx, (B, N, E), dtype=jnp.float32)
    w_qkv = jax.random.normal(k1, (E, 3 * E), dtype=jnp.float32) * 0.02
    b_qkv = jax.random.normal(k2, (1, 3 * E), dtype=jnp.float32) * 0.02
    w_out = jax.random.normal(k3, (E, E), dtype=jnp.float32) * 0.02
    b_out = jax.random.normal(k4, (1, E), dtype=jnp.float32) * 0.02

    ref = msa_reference(x, w_qkv, b_qkv, w_out, b_out, heads=heads)

    # f32 compute path (exact reciprocal -> tight tolerance).
    out_f32 = msa_forward(x, w_qkv, b_qkv, w_out, b_out, heads=heads,
                          compute_dtype=jnp.float32)
    out_f32 = jax.block_until_ready(out_f32)
    assert out_f32.shape == (B, N, E)
    assert jnp.allclose(out_f32, ref, atol=1e-3, rtol=1e-3), \
        "f32 mismatch vs reference"

    # bf16 matmul inputs, f32 accumulation / softmax (looser tolerance).
    out_bf16 = msa_forward(x, w_qkv, b_qkv, w_out, b_out, heads=heads,
                           compute_dtype=jnp.bfloat16)
    out_bf16 = jax.block_until_ready(out_bf16)
    assert jnp.allclose(out_bf16, ref, atol=5e-2, rtol=5e-2), \
        "bf16 mismatch vs reference"

    print("KERNEL_OK")
</pallas_src>

<mosaic_0001>
module attributes {stable_mosaic.version = 11 : i64} {
  func.func @msa_kernel(%arg0: i32, %arg1: memref<1x8x32xf32, #tpu.memory_space<vmem>>, %arg2: memref<32x96xf32, #tpu.memory_space<vmem>>, %arg3: memref<1x96xf32, #tpu.memory_space<vmem>>, %arg4: memref<32x32xf32, #tpu.memory_space<vmem>>, %arg5: memref<1x32xf32, #tpu.memory_space<vmem>>, %arg6: memref<1x8x32xf32, #tpu.memory_space<vmem>>, %arg7: memref<8x32xf32, #tpu.memory_space<vmem>>) attributes {dimension_semantics = [#tpu.dimension_semantics<parallel>], iteration_bounds = array<i64: 2>, scalar_prefetch = 0 : i64, scratch_operands = 1 : i64, tpu.core_type = #tpu.core_type<tc>, window_params = [{transform_indices = @transform_0, window_bounds = array<i64: 1, 8, 32>}, {pipeline_mode = #tpu.pipeline_mode<synchronous>, transform_indices = @transform_1, window_bounds = array<i64: 32, 96>}, {pipeline_mode = #tpu.pipeline_mode<synchronous>, transform_indices = @transform_2, window_bounds = array<i64: 1, 96>}, {pipeline_mode = #tpu.pipeline_mode<synchronous>, transform_indices = @transform_3, window_bounds = array<i64: 32, 32>}, {pipeline_mode = #tpu.pipeline_mode<synchronous>, transform_indices = @transform_4, window_bounds = array<i64: 1, 32>}, {transform_indices = @transform_5, window_bounds = array<i64: 1, 8, 32>}]} {
    %c0 = arith.constant 0 : index
    %c0_0 = arith.constant 0 : index
    %c0_1 = arith.constant 0 : index
    %0 = vector.load %arg1[%c0, %c0_0, %c0_1] : memref<1x8x32xf32, #tpu.memory_space<vmem>>, vector<1x8x32xf32>
    %1 = vector.shape_cast %0 : vector<1x8x32xf32> to vector<8x32xf32>
    %c0_2 = arith.constant 0 : index
    %c0_3 = arith.constant 0 : index
    %2 = vector.load %arg2[%c0_2, %c0_3] : memref<32x96xf32, #tpu.memory_space<vmem>>, vector<32x96xf32>
    %cst = arith.constant dense<0.000000e+00> : vector<8x96xf32>
    %3 = tpu.matmul %1, %2, %cst {dimension_numbers = #tpu.dot_dimension_numbers<[1], [0], [0], [1], [0, 0, 1, 1], [], []>} : vector<8x32xf32>, vector<32x96xf32>, vector<8x96xf32> -> vector<8x96xf32>
    %c0_4 = arith.constant 0 : index
    %c0_5 = arith.constant 0 : index
    %4 = vector.load %arg3[%c0_4, %c0_5] : memref<1x96xf32, #tpu.memory_space<vmem>>, vector<1x96xf32>
    %5 = vector.broadcast %4 : vector<1x96xf32> to vector<8x96xf32>
    %6 = arith.addf %3, %5 : vector<8x96xf32>
    %7 = vector.extract_strided_slice %6 {offsets = [0, 0], sizes = [8, 8], strides = [1, 1]} : vector<8x96xf32> to vector<8x8xf32>
    %cst_6 = arith.constant 0.353553385 : f32
    %8 = vector.broadcast %cst_6 : f32 to vector<8x8xf32>
    %9 = arith.mulf %7, %8 : vector<8x8xf32>
    %10 = vector.extract_strided_slice %6 {offsets = [0, 32], sizes = [8, 8], strides = [1, 1]} : vector<8x96xf32> to vector<8x8xf32>
    %11 = vector.extract_strided_slice %6 {offsets = [0, 64], sizes = [8, 8], strides = [1, 1]} : vector<8x96xf32> to vector<8x8xf32>
    %cst_7 = arith.constant dense<0.000000e+00> : vector<8x8xf32>
    %12 = tpu.matmul %9, %10, %cst_7 {dimension_numbers = #tpu.dot_dimension_numbers<[1], [1], [0], [0], [0, 0, 1, 0], [], []>} : vector<8x8xf32>, vector<8x8xf32>, vector<8x8xf32> -> vector<8x8xf32>
    %cst_8 = arith.constant dense<0xFF800000> : vector<8xf32>
    %13 = vector.multi_reduction <maximumf>, %12, %cst_8 [1] : vector<8x8xf32> to vector<8xf32>
    %14 = vector.shape_cast %13 : vector<8xf32> to vector<8x1xf32>
    %15 = vector.broadcast %14 : vector<8x1xf32> to vector<8x8xf32>
    %16 = arith.subf %12, %15 : vector<8x8xf32>
    %17 = math.exp %16 : vector<8x8xf32>
    %cst_9 = arith.constant dense<0.000000e+00> : vector<8xf32>
    %18 = vector.multi_reduction <add>, %17, %cst_9 [1] : vector<8x8xf32> to vector<8xf32>
    %19 = vector.shape_cast %18 : vector<8xf32> to vector<8x1xf32>
    %20 = tpu.reciprocal %19 : vector<8x1xf32> -> vector<8x1xf32>
    %cst_10 = arith.constant dense<0.000000e+00> : vector<8x8xf32>
    %21 = tpu.matmul %17, %11, %cst_10 {dimension_numbers = #tpu.dot_dimension_numbers<[1], [0], [0], [1], [0, 0, 1, 1], [], []>} : vector<8x8xf32>, vector<8x8xf32>, vector<8x8xf32> -> vector<8x8xf32>
    %22 = vector.broadcast %20 : vector<8x1xf32> to vector<8x8xf32>
    %23 = arith.mulf %21, %22 : vector<8x8xf32>
    %c0_11 = arith.constant 0 : index
    %c0_12 = arith.constant 0 : index
    %24 = vector.load %arg7[%c0_11, %c0_12] : memref<8x32xf32, #tpu.memory_space<vmem>>, vector<8x8xf32>
    tpu.vector_store %arg7[%c0_11, %c0_12], %23 {strides = array<i32>} : memref<8x32xf32, #tpu.memory_space<vmem>>, vector<8x8xf32>,
    %25 = vector.extract_strided_slice %6 {offsets = [0, 8], sizes = [8, 8], strides = [1, 1]} : vector<8x96xf32> to vector<8x8xf32>
    %cst_13 = arith.constant 0.353553385 : f32
    %26 = vector.broadcast %cst_13 : f32 to vector<8x8xf32>
    %27 = arith.mulf %25, %26 : vector<8x8xf32>
    %28 = vector.extract_strided_slice %6 {offsets = [0, 40], sizes = [8, 8], strides = [1, 1]} : vector<8x96xf32> to vector<8x8xf32>
    %29 = vector.extract_strided_slice %6 {offsets = [0, 72], sizes = [8, 8], strides = [1, 1]} : vector<8x96xf32> to vector<8x8xf32>
    %cst_14 = arith.constant dense<0.000000e+00> : vector<8x8xf32>
    %30 = tpu.matmul %27, %28, %cst_14 {dimension_numbers = #tpu.dot_dimension_numbers<[1], [1], [0], [0], [0, 0, 1, 0], [], []>} : vector<8x8xf32>, vector<8x8xf32>, vector<8x8xf32> -> vector<8x8xf32>
    %cst_15 = arith.constant dense<0xFF800000> : vector<8xf32>
    %31 = vector.multi_reduction <maximumf>, %30, %cst_15 [1] : vector<8x8xf32> to vector<8xf32>
    %32 = vector.shape_cast %31 : vector<8xf32> to vector<8x1xf32>
    %33 = vector.broadcast %32 : vector<8x1xf32> to vector<8x8xf32>
    %34 = arith.subf %30, %33 : vector<8x8xf32>
    %35 = math.exp %34 : vector<8x8xf32>
    %cst_16 = arith.constant dense<0.000000e+00> : vector<8xf32>
    %36 = vector.multi_reduction <add>, %35, %cst_16 [1] : vector<8x8xf32> to vector<8xf32>
    %37 = vector.shape_cast %36 : vector<8xf32> to vector<8x1xf32>
    %38 = tpu.reciprocal %37 : vector<8x1xf32> -> vector<8x1xf32>
    %cst_17 = arith.constant dense<0.000000e+00> : vector<8x8xf32>
    %39 = tpu.matmul %35, %29, %cst_17 {dimension_numbers = #tpu.dot_dimension_numbers<[1], [0], [0], [1], [0, 0, 1, 1], [], []>} : vector<8x8xf32>, vector<8x8xf32>, vector<8x8xf32> -> vector<8x8xf32>
    %40 = vector.broadcast %38 : vector<8x1xf32> to vector<8x8xf32>
    %41 = arith.mulf %39, %40 : vector<8x8xf32>
    %c0_18 = arith.constant 0 : index
    %c8 = arith.constant 8 : index
    %42 = vector.load %arg7[%c0_18, %c8] : memref<8x32xf32, #tpu.memory_space<vmem>>, vector<8x8xf32>
    tpu.vector_store %arg7[%c0_18, %c8], %41 {strides = array<i32>} : memref<8x32xf32, #tpu.memory_space<vmem>>, vector<8x8xf32>,
    %43 = vector.extract_strided_slice %6 {offsets = [0, 16], sizes = [8, 8], strides = [1, 1]} : vector<8x96xf32> to vector<8x8xf32>
    %cst_19 = arith.constant 0.353553385 : f32
    %44 = vector.broadcast %cst_19 : f32 to vector<8x8xf32>
    %45 = arith.mulf %43, %44 : vector<8x8xf32>
    %46 = vector.extract_strided_slice %6 {offsets = [0, 48], sizes = [8, 8], strides = [1, 1]} : vector<8x96xf32> to vector<8x8xf32>
    %47 = vector.extract_strided_slice %6 {offsets = [0, 80], sizes = [8, 8], strides = [1, 1]} : vector<8x96xf32> to vector<8x8xf32>
    %cst_20 = arith.constant dense<0.000000e+00> : vector<8x8xf32>
    %48 = tpu.matmul %45, %46, %cst_20 {dimension_numbers = #tpu.dot_dimension_numbers<[1], [1], [0], [0], [0, 0, 1, 0], [], []>} : vector<8x8xf32>, vector<8x8xf32>, vector<8x8xf32> -> vector<8x8xf32>
    %cst_21 = arith.constant dense<0xFF800000> : vector<8xf32>
    %49 = vector.multi_reduction <maximumf>, %48, %cst_21 [1] : vector<8x8xf32> to vector<8xf32>
    %50 = vector.shape_cast %49 : vector<8xf32> to vector<8x1xf32>
    %51 = vector.broadcast %50 : vector<8x1xf32> to vector<8x8xf32>
    %52 = arith.subf %48, %51 : vector<8x8xf32>
    %53 = math.exp %52 : vector<8x8xf32>
    %cst_22 = arith.constant dense<0.000000e+00> : vector<8xf32>
    %54 = vector.multi_reduction <add>, %53, %cst_22 [1] : vector<8x8xf32> to vector<8xf32>
    %55 = vector.shape_cast %54 : vector<8xf32> to vector<8x1xf32>
    %56 = tpu.reciprocal %55 : vector<8x1xf32> -> vector<8x1xf32>
    %cst_23 = arith.constant dense<0.000000e+00> : vector<8x8xf32>
    %57 = tpu.matmul %53, %47, %cst_23 {dimension_numbers = #tpu.dot_dimension_numbers<[1], [0], [0], [1], [0, 0, 1, 1], [], []>} : vector<8x8xf32>, vector<8x8xf32>, vector<8x8xf32> -> vector<8x8xf32>
    %58 = vector.broadcast %56 : vector<8x1xf32> to vector<8x8xf32>
    %59 = arith.mulf %57, %58 : vector<8x8xf32>
    %c0_24 = arith.constant 0 : index
    %c16 = arith.constant 16 : index
    %60 = vector.load %arg7[%c0_24, %c16] : memref<8x32xf32, #tpu.memory_space<vmem>>, vector<8x8xf32>
    tpu.vector_store %arg7[%c0_24, %c16], %59 {strides = array<i32>} : memref<8x32xf32, #tpu.memory_space<vmem>>, vector<8x8xf32>,
    %61 = vector.extract_strided_slice %6 {offsets = [0, 24], sizes = [8, 8], strides = [1, 1]} : vector<8x96xf32> to vector<8x8xf32>
    %cst_25 = arith.constant 0.353553385 : f32
    %62 = vector.broadcast %cst_25 : f32 to vector<8x8xf32>
    %63 = arith.mulf %61, %62 : vector<8x8xf32>
    %64 = vector.extract_strided_slice %6 {offsets = [0, 56], sizes = [8, 8], strides = [1, 1]} : vector<8x96xf32> to vector<8x8xf32>
    %65 = vector.extract_strided_slice %6 {offsets = [0, 88], sizes = [8, 8], strides = [1, 1]} : vector<8x96xf32> to vector<8x8xf32>
    %cst_26 = arith.constant dense<0.000000e+00> : vector<8x8xf32>
    %66 = tpu.matmul %63, %64, %cst_26 {dimension_numbers = #tpu.dot_dimension_numbers<[1], [1], [0], [0], [0, 0, 1, 0], [], []>} : vector<8x8xf32>, vector<8x8xf32>, vector<8x8xf32> -> vector<8x8xf32>
    %cst_27 = arith.constant dense<0xFF800000> : vector<8xf32>
    %67 = vector.multi_reduction <maximumf>, %66, %cst_27 [1] : vector<8x8xf32> to vector<8xf32>
    %68 = vector.shape_cast %67 : vector<8xf32> to vector<8x1xf32>
    %69 = vector.broadcast %68 : vector<8x1xf32> to vector<8x8xf32>
    %70 = arith.subf %66, %69 : vector<8x8xf32>
    %71 = math.exp %70 : vector<8x8xf32>
    %cst_28 = arith.constant dense<0.000000e+00> : vector<8xf32>
    %72 = vector.multi_reduction <add>, %71, %cst_28 [1] : vector<8x8xf32> to vector<8xf32>
    %73 = vector.shape_cast %72 : vector<8xf32> to vector<8x1xf32>
    %74 = tpu.reciprocal %73 : vector<8x1xf32> -> vector<8x1xf32>
    %cst_29 = arith.constant dense<0.000000e+00> : vector<8x8xf32>
    %75 = tpu.matmul %71, %65, %cst_29 {dimension_numbers = #tpu.dot_dimension_numbers<[1], [0], [0], [1], [0, 0, 1, 1], [], []>} : vector<8x8xf32>, vector<8x8xf32>, vector<8x8xf32> -> vector<8x8xf32>
    %76 = vector.broadcast %74 : vector<8x1xf32> to vector<8x8xf32>
    %77 = arith.mulf %75, %76 : vector<8x8xf32>
    %c0_30 = arith.constant 0 : index
    %c24 = arith.constant 24 : index
    %78 = vector.load %arg7[%c0_30, %c24] : memref<8x32xf32, #tpu.memory_space<vmem>>, vector<8x8xf32>
    tpu.vector_store %arg7[%c0_30, %c24], %77 {strides = array<i32>} : memref<8x32xf32, #tpu.memory_space<vmem>>, vector<8x8xf32>,
    %c0_31 = arith.constant 0 : index
    %c0_32 = arith.constant 0 : index
    %79 = vector.load %arg7[%c0_31, %c0_32] : memref<8x32xf32, #tpu.memory_space<vmem>>, vector<8x32xf32>
    %c0_33 = arith.constant 0 : index
    %c0_34 = arith.constant 0 : index
    %80 = vector.load %arg4[%c0_33, %c0_34] : memref<32x32xf32, #tpu.memory_space<vmem>>, vector<32x32xf32>
    %cst_35 = arith.constant dense<0.000000e+00> : vector<8x32xf32>
    %81 = tpu.matmul %79, %80, %cst_35 {dimension_numbers = #tpu.dot_dimension_numbers<[1], [0], [0], [1], [0, 0, 1, 1], [], []>} : vector<8x32xf32>, vector<32x32xf32>, vector<8x32xf32> -> vector<8x32xf32>
    %c0_36 = arith.constant 0 : index
    %c0_37 = arith.constant 0 : index
    %82 = vector.load %arg5[%c0_36, %c0_37] : memref<1x32xf32, #tpu.memory_space<vmem>>, vector<1x32xf32>
    %83 = vector.broadcast %82 : vector<1x32xf32> to vector<8x32xf32>
    %84 = arith.addf %81, %83 : vector<8x32xf32>
    %c0_38 = arith.constant 0 : index
    %c0_39 = arith.constant 0 : index
    %c0_40 = arith.constant 0 : index
    %85 = vector.load %arg6[%c0_38, %c0_39, %c0_40] : memref<1x8x32xf32, #tpu.memory_space<vmem>>, vector<1x8x32xf32>
    %86 = vector.shape_cast %85 : vector<1x8x32xf32> to vector<8x32xf32>
    %87 = vector.shape_cast %84 : vector<8x32xf32> to vector<1x8x32xf32>
    tpu.vector_store %arg6[%c0_38, %c0_39, %c0_40], %87 {strides = array<i32>} : memref<1x8x32xf32, #tpu.memory_space<vmem>>, vector<1x8x32xf32>,
    return
  }
  func.func @transform_0(%arg0: i32) -> (i32, i32, i32) {
    %c0_i32 = arith.constant 0 : i32
    %c0_i32_0 = arith.constant 0 : i32
    %c0_i32_1 = arith.constant 0 : i32
    return %arg0, %c0_i32, %c0_i32_0 : i32, i32, i32
  }
  func.func @transform_1(%arg0: i32) -> (i32, i32) {
    %c0_i32 = arith.constant 0 : i32
    %c0_i32_0 = arith.constant 0 : i32
    %c0_i32_1 = arith.constant 0 : i32
    return %c0_i32, %c0_i32_0 : i32, i32
  }
  func.func @transform_2(%arg0: i32) -> (i32, i32) {
    %c0_i32 = arith.constant 0 : i32
    %c0_i32_0 = arith.constant 0 : i32
    %c0_i32_1 = arith.constant 0 : i32
    return %c0_i32, %c0_i32_0 : i32, i32
  }
  func.func @transform_3(%arg0: i32) -> (i32, i32) {
    %c0_i32 = arith.constant 0 : i32
    %c0_i32_0 = arith.constant 0 : i32
    %c0_i32_1 = arith.constant 0 : i32
    return %c0_i32, %c0_i32_0 : i32, i32
  }
  func.func @transform_4(%arg0: i32) -> (i32, i32) {
    %c0_i32 = arith.constant 0 : i32
    %c0_i32_0 = arith.constant 0 : i32
    %c0_i32_1 = arith.constant 0 : i32
    return %c0_i32, %c0_i32_0 : i32, i32
  }
  func.func @transform_5(%arg0: i32) -> (i32, i32, i32) {
    %c0_i32 = arith.constant 0 : i32
    %c0_i32_0 = arith.constant 0 : i32
    %c0_i32_1 = arith.constant 0 : i32
    return %arg0, %c0_i32, %c0_i32_0 : i32, i32, i32
  }
}

</mosaic_0001>

<bundles_post_ra>
// kernel: tpu_custom_call.1
= control target key start
LH: loop header
LB: loop body
LE: loop exit
PB: predicated region body
PF: predicated region fallthrough
CT: control target
= control target key end

     0   :  { %10 = vsyncpa [#allocation4], 0  ;;  %s1976_s0 = inlined_call_operand.hbm [shape: f32[2,8,32], index: 0, kind: input, shape index: {}]   ;;  %s1977_s1 = inlined_call_operand.hbm [shape: f32[32,96], index: 1, kind: input, shape index: {}]   ;;  %s1978_s2 = inlined_call_operand.vmem [shape: f32[1,96], index: 2, kind: input, shape index: {}]   ;;  %s1979_s3 = inlined_call_operand.hbm [shape: f32[32,32], index: 3, kind: input, shape index: {}]   ;;  %s1980_s4 = inlined_call_operand.vmem [shape: f32[1,32], index: 4, kind: input, shape index: {}]   ;;  %s1981_s5 = inlined_call_operand.hbm [shape: f32[2,8,32], index: 5, kind: output, shape index: {}]  }
   0x1   :  { %12 = vsyncpa [#allocation4 + $0x1], 0 }
   0x2   :  { %13 = vsyncpa [#allocation7], 0 }
   0x3   :  { %14 = vsyncpa [#allocation5], 0 }
   0x4   :  { %16 = vsyncpa [#allocation5 + $0x1], 0  ;;  %s1670_s18 = smov 0   ;;  %s1672_s19 = smov 0  }
   0x5   :  { %s1674_s20 = smov 0   ;;  %s1676_s21 = smov 0  }
   0x6 LB: > { %s1691_s22 = sadd.s32 4294967295, %s1615_s21   ;;  %s1225_s23 = sadd.s32 4294967294, %s1615_s21   ;;  %s1615_s21 = sphi %s1676_s21, %s2001_s21   ;;  %s1611_s20 = sphi %s1674_s20, %s2000_s20   ;;  %s1607_s19 = sphi %s1672_s19, %s1999_s19   ;;  %s1603_s18 = sphi %s1670_s18, %s1998_s18  }
   0x7   : > { %p42_p0 = scmp.ne.s32.totalorder %s1607_s19, %s1603_s18  ;;  %p1982_p1 = scmp.eq.s32.totalorder %s1691_s22, 0 }
   0x8   : > { %p156_p3 = scmp.eq.s32.totalorder %s1225_s23, 1  ;;  %p1226_p5 = scmp.ge.s32.totalorder %s1615_s21, 1 }
   0x9   : > { %p1700_p4 = por %p1982_p1, %p42_p0  ;;  %p163_p7 = scmp.lt.s32.totalorder %s1615_s21, 3 }
   0xa   : > { %p1705_p6 = por %p156_p3, %p42_p0  ;;  %s1617_s27 = smov [#allocation6]  }
   0xb   : > { %s1985_s24 = scalar_select %p1700_p4, 1, 0 }
   0xc   : > { %s1986_s25 = scalar_select %p1705_p6, 1, 0 }
   0xd   : > { %p1710_p8 = pnand %p1226_p5, %p163_p7  ;;  %s175_s28 = sshll.u32 %s1617_s27, 4  ;;  %s1714_s28 = int_to_ptr.vmem [resolvable:$true] %s175_s28 }
   0xe   : > { %s1618_s30 = smov [#allocation8]   ;;  %s1459_s9 = scalar_lea.hbm %s1977_s1, 512 }
   0xf   : > { %p1369_p9 = pneg %p1710_p8  ;;  %s191_s6 = sshll.u32 %s1618_s30, 4  ;;  %s1725_s6 = int_to_ptr.vmem [resolvable:$true] %s191_s6 }
  0x10   : > { %p1460_p12 = scmp.ne.s32.totalorder %s1977_s1, %s1459_s9  ;;  %p1466_p5 = scmp.lt.u32.totalorder %s1459_s9, %s1977_s1 }
  0x11   : > { %p1721_p11 = pnand %p1369_p9, %p1982_p1 }
  0x13   : > { %p1461_p13 = pneg %p1721_p11 }
  0x15   : > { %p1462_p0 = pnand %p1461_p13, %p1460_p12 }
  0x17   : > { %p1463_p3 = pneg %p1462_p0 }
  0x19   : > { %p1468_p7 = pnand %p1466_p5, %p1463_p3 }
  0x1b   : > { %1471 = shalt.err (!%p1468_p7)
}
  0x1c   : > { %s1472_s14 = scalar_lea.vmem %s1714_s28, 512  ;;  %p1480_p2 = scmp.lt.s32.totalorder %s1714_s28, %s1714_s28 }
  0x1d   : > { %p1473_p9 = scmp.ne.s32.totalorder %s1714_s28, %s1472_s14  ;;  %p1481_p12 = scmp.lt.s32.totalorder %s1472_s14, %s1472_s14 }
  0x1f   : > { %p1475_p10 = pnand %p1473_p9, %p1461_p13  ;;  %p1482_p0 = por %p1481_p12, %p1480_p2 }
  0x21   : > { %p1476_p1 = pneg %p1475_p10 }
  0x23   : > { %p1483_p6 = pnand %p1482_p0, %p1476_p1 }
  0x25   : > { %1486 = shalt.err (!%p1483_p6)
}
  0x26   : > { %s1619_s15 = smov 128   ;;  %s1620_s16 = smov 8  }
  0x27   : > { %1372 = dma.hbm_to_vmem [thread:$0]  (!%p1721_p11), %s1977_s1, 512, %s1714_s28, [#allocation7], %s1619_s15, %s1619_s15, %s1620_s16  }
  0x28   : > { %s1487_s7 = scalar_lea.hbm %s1979_s3, 512 }
  0x29   : > { %p1488_p2 = scmp.ne.s32.totalorder %s1979_s3, %s1487_s7  ;;  %p1494_p10 = scmp.lt.u32.totalorder %s1487_s7, %s1979_s3 }
  0x2b   : > { %p1490_p1 = pnand %p1488_p2, %p1461_p13 }
  0x2d   : > { %p1491_p6 = pneg %p1490_p1 }
  0x2f   : > { %p1496_p3 = pnand %p1494_p10, %p1491_p6 }
  0x31   : > { %1499 = shalt.err (!%p1496_p3)
}
  0x32   : > { %s1500_s28 = scalar_lea.vmem %s1725_s6, 512  ;;  %p1508_p12 = scmp.lt.s32.totalorder %s1725_s6, %s1725_s6 }
  0x33   : > { %p1501_p5 = scmp.ne.s32.totalorder %s1725_s6, %s1500_s28  ;;  %p1509_p0 = scmp.lt.s32.totalorder %s1500_s28, %s1500_s28 }
  0x35   : > { %p1503_p7 = pnand %p1501_p5, %p1461_p13  ;;  %p1510_p2 = por %p1509_p0, %p1508_p12 }
  0x37   : > { %p1504_p9 = pneg %p1503_p7 }
  0x39   : > { %p1511_p1 = pnand %p1510_p2, %p1504_p9 }
  0x3b   : > { %1514 = shalt.err (!%p1511_p1)
}
  0x3c   : > { %1375 = dma.hbm_to_vmem [thread:$0]  (!%p1721_p11), %s1979_s3, 512, %s1725_s6, [#allocation7], %s1619_s15, %s1619_s15, %s1620_s16  }
  0x3d   : > { %s1780_s14 = sadd.s32 1, %s1615_s21   ;;  %s29_s29 = sadd.s32 1, %s1611_s20 }
  0x3e   : > { %s26_s17 = ssub.s32 %s1615_s21, %s1780_s14  ;;  %p36_p13 = scmp.ne.s32.totalorder %s1611_s20, %s1607_s19 }
  0x3f   : > { %p27_p6 = scmp.eq.s32.totalorder %s26_s17, 0  ;;  %p37_p10 = scmp.eq.s32.totalorder %s1615_s21, 0 }
  0x40   : > { %p1989_p3 = scmp.eq.s32.totalorder %s1691_s22, 1  ;;  %p1386_p7 = scmp.lt.s32.totalorder %s1615_s21, 2 }
  0x41   : > { %s1796_s27 = scalar_select %p27_p6, %s1611_s20, %s29_s29  }
  0x42   : > { %p1790_p5 = por %p1989_p3, %p36_p13  ;;  %p38_p9 = por %p37_p10, %p36_p13 }
  0x43   : > { %s208_s30 = sand.u32 1, %s1611_s20   ;;  %s1231_s6 = sshll.u32 %s1615_s21, 7 }
  0x44   : > { %s1990_s23 = scalar_select %p1790_p5, 1, 0 }
  0x45   : > { %s1230_s7 = sshll.u32 %s208_s30, 3  ;;  %s1803_s8 = scalar_lea.hbm %s1976_s0, %s1231_s6 }
  0x46   : > { %s212_s9 = scalar_lea.vmem [#allocation3], %s1230_s7  ;;  %p1807_p11 = pnand %p1386_p7, %p38_p9 }
  0x47   : > { %s219_s10 = sshll.u32 %s212_s9, 4  ;;  %s209_s28 = scalar_lea.sflag [#allocation4], %s208_s30  ;;  %s1805_s10 = int_to_ptr.vmem [resolvable:$true] %s219_s10 }
  0x48   : > { %s1515_s12 = scalar_lea.hbm %s1803_s8, 128  ;;  %p1517_p0 = pneg %p1807_p11 }
  0x49   : > { %p1516_p12 = scmp.ne.s32.totalorder %s1803_s8, %s1515_s12  ;;  %s1520_s17 = scalar_lea.hbm %s1976_s0, 256 }
  0x4a   : > { %p1521_p13 = scmp.lt.u32.totalorder %s1803_s8, %s1976_s0  ;;  %p1522_p6 = scmp.lt.u32.totalorder %s1520_s17, %s1515_s12 }
  0x4b   : > { %p1518_p2 = pnand %p1517_p0, %p1516_p12  ;;  %p1524_p3 = scmp.lt.u32.totalorder %s1515_s12, %s1803_s8 }
  0x4c   : > { %p1523_p10 = por %p1522_p6, %p1521_p13 }
  0x4d   : > { %p1519_p1 = pneg %p1518_p2 }
  0x4e   : > { %p1525_p7 = por %p1524_p3, %p1523_p10 }
  0x50   : > { %p1526_p9 = pnand %p1525_p7, %p1519_p1 }
  0x52   : > { %1529 = shalt.err (!%p1526_p9)
}
  0x53   : > { %s1530_s30 = scalar_lea.vmem %s1805_s10, 128  ;;  %s1621_s15 = smov [#allocation3]  }
  0x54   : > { %p1531_p12 = scmp.ne.s32.totalorder %s1805_s10, %s1530_s30  ;;  %s1535_s16 = sshll.u32 %s1621_s15, 4  ;;  %s1536_s16 = int_to_ptr.vmem [resolvable:$false] %s1535_s16 }
  0x55   : > { %s1537_s9 = scalar_lea.vmem %s1536_s16, 256  ;;  %p1538_p4 = scmp.lt.s32.totalorder %s1805_s10, %s1536_s16 }
  0x56   : > { %p1533_p2 = pnand %p1531_p12, %p1517_p0  ;;  %p1539_p13 = scmp.lt.s32.totalorder %s1537_s9, %s1530_s30 }
  0x58   : > { %p1534_p5 = pneg %p1533_p2  ;;  %p1540_p6 = por %p1539_p13, %p1538_p4 }
  0x5a   : > { %p1541_p10 = pnand %p1540_p6, %p1534_p5 }
  0x5c   : > { %1544 = shalt.err (!%p1541_p10)
}
  0x5d   : > { %1379 = dma.hbm_to_vmem [thread:$0]  (!%p1807_p11), %s1803_s8, 128, %s1805_s10, %s209_s28  }
  0x5e   : > { %228 = sbr.rel (%p1710_p8) target bundleno = 1764 (0x6e4), region = 40  ;;  %s1839_s12 = sand.u32 (!%p1710_p8), 1, %s1607_s19  }
  0x5f   : > { %s1233_s13 = sshll.u32 (!%p1710_p8), %s1839_s12, 3  ;;  %s231_s29 = scalar_lea.sflag (!%p1710_p8), [#allocation4], %s1839_s12 }
  0x60   : > { %s234_s17 = scalar_lea.vmem (!%p1710_p8), [#allocation3], %s1233_s13  ;;  %p1992_p4 = scmp.ne.s32.totalorder (!%p1710_p8), %s1985_s24, 0 }
  0x65   : > { %1590 = dma.done.wait (%p1992_p4), %s231_s29, 128  }
  0x66   : > { %1592 = vsyncadd (%p1992_p4), %s231_s29, 4294967168  ;;  %p1993_p5 = scmp.eq.s32.totalorder %s1691_s22, 0 }
  0x68   : > { %1594 = dma.done.wait (%p1993_p5), [#allocation7], 1024   ;;  %p1994_p8 = pmov %p1993_p5 }
  0x69   : > { %v1622_v0 = vmov 0.0|0.0   ;;  %vm1623_vm0 = vmmov 0   ;;  %v1624_v1 = vmov 0.0   ;;  %v270_v2 = vld [vmem:[#allocation6] sm:$0xff]  ;;  %v271_v3 = vld [vmem:[#allocation6 + $0x8] sm:$0xff]  ;;  %v272_v4 = vld [vmem:[#allocation6 + $0x10] sm:$0xff] }
  0x6a   : > { %1596 = vsyncadd (%p1994_p8), [#allocation7], 4294966272  ;;  %1345 = vmatprep.subr.bf16.mxu0 %v1622_v0  ;;  %1291 = vmatprep.mubr.msk.f32.mxu0 %vm1623_vm0, %v1624_v1  ;;  %v1346_v5 = vpack.c.bf16 %v271_v3, %v270_v2  ;;  %v273_v6 = vld [vmem:[#allocation6 + $0x18] sm:$0xff]  ;;  %vm281_vm1 = vcmask 261120   ;;  %v1237_v9 = vld [vmem:[%s1978_s2] ss:$0 sm:$0xff] }
  0x6b   : > { %1294 = vmatprep.subr.mxu1 %v1624_v1  ;;  %1296 = vmatprep.mubr.msk.f32.mxu1 %vm1623_vm0, %v1624_v1  ;;  %v1349_v7 = vpack.c.bf16 %v273_v6, %v272_v4  ;;  %v269_v8 = vld [vmem:[%s234_s17] sm:$0xff]  ;;  %s1625_s8 = smov 64   ;;  %s1626_s10 = smov 96   ;;  %vm359_vm2 = vcmask 64512   ;;  %v1037_v3 = vld [vmem:[#allocation8] sm:$0xff]  ;;  %v1038_v4 = vld [vmem:[#allocation8 + $0x8] sm:$0xff] }
  0x6c   : > { %1347 = vmatpush3.bf16.msra.mxu0 %v1346_v5  ;;  %s1627_s11 = smov 88   ;;  %s1628_s28 = smov 120   ;;  %v1039_v5 = vld [vmem:[#allocation8 + $0x10] sm:$0xff]  ;;  %v1040_v6 = vld [vmem:[#allocation8 + $0x18] sm:$0xff]  ;;  %vm692_vm3 = vcmask 130112   ;;  %vm863_vm4 = vcmask 195712  }
  0x6d   : > { %1348 = vmatprep.subr.bf16.mxu0 %v1622_v0  ;;  %s1629_s7 = smov 80   ;;  %s1630_s6 = smov 112   ;;  %vm1034_vm5 = vcmask 261312  }
  0x6e   : > { %s1631_s30 = smov 72   ;;  %s1632_s15 = smov 104  }
  0x6f   : > { %s1633_s16 = smov 56   ;;  %s1634_s9 = smov 40  }
  0x70   : > { %1350 = vmatpush3.bf16.msra.mxu0 %v1349_v7  ;;  %s1635_s29 = smov 48   ;;  %s1636_s17 = smov 8  }
  0x71   : > { %1314 = vmatprep.subr.mxu0 %v1624_v1  ;;  %s1637_s24 = smov 16   ;;  %s1638_s26 = smov 24  }
  0x72   : > { %p1995_p0 = scmp.ne.s32.totalorder %s1990_s23, 0 }
  0x73   : > { %1292 = vmatmul.mubr.msk.f32.vlgmr.msra.gmra.mrb[0].mxu0 %vm281_vm1, %v269_v8 }
  0x74   : > { %1316 = vmatprep.mubr.msk.f32.mxu0 %vm1623_vm0, %v1624_v1 }
 0x146   : > { %v351_v10 = vpop.f32.mrb[0].mxu0 }
 0x147   : > { %v1867_v11 = vadd.f32 %v1237_v9, %v351_v10  ;;  %v1293_v12 = vpop.f32.mrb[1].mxu0  ;;  %v1355_v9 = vpack.c.bf16 %v1040_v6, %v1039_v5 }
 0x149   : > { %445 = vrot.lane.b32.xlu1 %v1867_v11, %s1625_s8  ;;  %357 = vrot.lane.b32.xlu0 %v1867_v11, %s1626_s10  ;;  %v355_v13 = vmul.f32 0.35355338, %v1867_v11 }
 0x14d   : > { %525 = vrot.lane.b32.xlu1 %v1867_v11, %s1627_s11  ;;  %s1254_s11 = sshll.u32 %s1691_s22, 7 }
 0x151   : > { %523 = vrot.lane.b32.xlu1 %v355_v13, %s1628_s28  ;;  %s268_s28 = scalar_lea.vmem [#allocation9], %s1233_s13  ;;  %s1639_s13 = smov [#allocation9]  }
 0x155   : > { %696 = vrot.lane.b32.xlu1 %v1867_v11, %s1629_s7  ;;  %s1136_s7 = sshll.u32 %s268_s28, 4  ;;  %s1933_s7 = int_to_ptr.vmem [resolvable:$true] %s1136_s7 }
 0x156   : > { %s1545_s22 = scalar_lea.vmem %s1933_s7, 128 }
 0x157   : > { %p1546_p11 = scmp.ne.s32.totalorder %s1933_s7, %s1545_s22 }
 0x159   : > { %694 = vrot.lane.b32.xlu1 %v355_v13, %s1630_s6  ;;  %p1547_p1 = pnand %p1546_p11, %p1995_p0 }
 0x15b   : > { %p1548_p3 = pneg %p1547_p1 }
 0x15d   : > { %867 = vrot.lane.b32.xlu1 %v1867_v11, %s1631_s30 }
 0x161   : > { %865 = vrot.lane.b32.xlu1 %v355_v13, %s1632_s15  ;;  %s1931_s15 = scalar_lea.hbm %s1981_s5, %s1254_s11 }
 0x1bb   : > { %v446_v14 = vpop.permute.xlu1 %445  ;;  %v358_v15 = vpop.permute.xlu0 %357 }
 0x1bc   : > { %1295 = vmatpush3.xpose.msk.msra.mxu1 %vm359_vm2, %v358_v15 }
 0x1bd   : > { %1299 = vmatprep.subr.mxu1 %v1624_v1 }
 0x1bf   : > { %v526_v16 = vpop.permute.xlu1 %525  ;;  %1297 = vmatmul.mubr.msk.f32.vlgmr.msra.gmra.mrb[0].mxu1 %vm359_vm2, %v355_v13 }
 0x1c0   : > { %1300 = vmatpush3.msra.mxu1 %v446_v14  ;;  %1301 = vmatprep.mubr.msk.f32.mxu1 %vm1623_vm0, %v1624_v1 }
 0x1c1   : > { %1304 = vmatprep.subr.mxu1 %v1624_v1 }
 0x1c3   : > { %v524_v17 = vpop.permute.xlu1 %523 }
 0x1c7   : > { %v697_v18 = vpop.permute.xlu1 %696 }
 0x1c8   : > { %1315 = vmatpush3.xpose.msk.msra.mxu0 %vm359_vm2, %v697_v18 }
 0x1c9   : > { %1324 = vmatprep.subr.mxu0 %v1624_v1 }
 0x1cb   : > { %v695_v19 = vpop.permute.xlu1 %694 }
 0x1cc   : > { %1317 = vmatmul.mubr.msk.f32.vlgmr.msra.gmra.mrb[2].mxu0 %vm359_vm2, %v695_v19 }
 0x1cd   : > { %1326 = vmatprep.mubr.msk.f32.mxu0 %vm1623_vm0, %v1624_v1 }
 0x1cf   : > { %v868_v20 = vpop.permute.xlu1 %867 }
 0x1d0   : > { %1325 = vmatpush3.xpose.msk.msra.mxu0 %vm359_vm2, %v868_v20 }
 0x1d1   : > { %1351 = vmatprep.subr.bf16.mxu0 %v1622_v0 }
 0x1d3   : > { %v866_v21 = vpop.permute.xlu1 %865 }
 0x1d4   : > { %1327 = vmatmul.mubr.msk.f32.vlgmr.msra.gmra.mrb[4].mxu0 %vm359_vm2, %v866_v21 }
 0x1d5   : > { %1342 = vmatprep.mubr.msk.f32.mxu0 %vm1623_vm0, %v1624_v1 }
 0x292   : > { %v431_v22 = vpop.f32.mrb[0].mxu1 }
 0x293   : > { %v1298_v23 = vpop.f32.mrb[1].mxu1  ;;  %v435_v24 = vsel %vm359_vm2, %v431_v22, -inf }
 0x294   : > { %436 = vmax.xlane.f32.xlu0 %v435_v24  ;;  %v1251_v23 = vld [vmem:[%s1980_s4] ss:$0 sm:$0xff] }
 0x29f   : > { %v768_v25 = vpop.f32.mrb[2].mxu0 }
 0x2a0   : > { %v1318_v26 = vpop.f32.mrb[3].mxu0  ;;  %v772_v29 = vsel %vm359_vm2, %v768_v25, -inf }
 0x2a7   : > { %v939_v27 = vpop.f32.mrb[4].mxu0 }
 0x2a8   : > { %v1328_v28 = vpop.f32.mrb[5].mxu0  ;;  %v943_v30 = vsel %vm359_vm2, %v939_v27, -inf }
 0x2aa   : > { %611 = vrot.lane.b32.xlu0 %v1867_v11, %s1633_s16  ;;  %s1123_s16 = scalar_lea.sflag [#allocation5], %s1839_s12 }
 0x2c9   : > { %773 = vmax.xlane.f32.xlu0 %v772_v29 }
 0x2cd   : > { %944 = vmax.xlane.f32.xlu0 %v943_v30 }
 0x2e3   : > { %953 = vrot.lane.b32.xlu0 %v1867_v11, %s1634_s9  ;;  %s1549_s9 = sshll.u32 %s1639_s13, 4  ;;  %s1550_s9 = int_to_ptr.vmem [resolvable:$false] %s1549_s9 }
 0x2e4   : > { %p1552_p7 = scmp.lt.s32.totalorder %s1933_s7, %s1550_s9 }
 0x321   : > { %v437_v31 = vpop.xlane.xlu0 %436 }
 0x322   : > { %v438_v32 = vsub.f32 %v431_v22, %v437_v31 }
 0x324   : > { %v439_v33 = vmul.f32 1.442695, %v438_v32 }
 0x325   : > { %v612_v35 = vpop.permute.xlu0 %611 }
 0x326   : > { %1443 = vpow2.f32 %v439_v33 }
 0x330   : > { %v1444_v34 = vpop.eup %1443 }
 0x331   : > { %1302 = vmatmul.mubr.msk.f32.vlgmr.msra.gmra.mrb[2].mxu1 %vm359_vm2, %v1444_v34  ;;  %v441_v58 = vsel %vm359_vm2, %v1444_v34, 0.0 }
 0x332   : > { %1305 = vmatpush3.xpose.msk.msra.mxu1 %vm359_vm2, %v526_v16  ;;  %1306 = vmatprep.mubr.msk.f32.mxu1 %vm1623_vm0, %v1624_v1 }
 0x333   : > { %1309 = vmatprep.subr.mxu1 %v1624_v1 }
 0x335   : > { %1307 = vmatmul.mubr.msk.f32.vlgmr.msra.gmra.mrb[4].mxu1 %vm359_vm2, %v524_v17 }
 0x336   : > { %1310 = vmatpush3.msra.mxu1 %v612_v35  ;;  %1311 = vmatprep.mubr.msk.f32.mxu1 %vm1623_vm0, %v1624_v1 }
 0x337   : > { %1319 = vmatprep.subr.mxu1 %v1624_v1 }
 0x356   : > { %v774_v41 = vpop.xlane.xlu0 %773 }
 0x357   : > { %v775_v42 = vsub.f32 %v768_v25, %v774_v41 }
 0x359   : > { %v776_v43 = vmul.f32 1.442695, %v775_v42 }
 0x35a   : > { %v945_v46 = vpop.xlane.xlu0 %944 }
 0x35b   : > { %1445 = vpow2.f32 %v776_v43  ;;  %v946_v47 = vsub.f32 %v939_v27, %v945_v46 }
 0x35d   : > { %v947_v50 = vmul.f32 1.442695, %v946_v47 }
 0x35e   : > { %v954_v56 = vpop.permute.xlu0 %953 }
 0x365   : > { %v1446_v44 = vpop.eup %1445 }
 0x366   : > { %v778_v45 = vsel %vm359_vm2, %v1446_v44, 0.0 }
 0x404   : > { %v517_v36 = vpop.f32.mrb[2].mxu1 }
 0x405   : > { %v1303_v37 = vpop.f32.mrb[3].mxu1 }
 0x408   : > { %v597_v38 = vpop.f32.mrb[4].mxu1 }
 0x409   : > { %v1308_v39 = vpop.f32.mrb[5].mxu1  ;;  %v601_v40 = vsel %vm359_vm2, %v597_v38, -inf }
 0x40a   : > { %602 = vmax.xlane.f32.xlu1 %v601_v40 }
 0x41b   : > { %782 = vrot.lane.b32.xlu1 %v1867_v11, %s1635_s29  ;;  %s1551_s29 = scalar_lea.vmem %s1550_s9, 256 }
 0x41c   : > { %p1553_p9 = scmp.lt.s32.totalorder %s1551_s29, %s1545_s22 }
 0x41e   : > { %p1554_p12 = por %p1553_p9, %p1552_p7 }
 0x420   : > { %p1555_p2 = pnand %p1554_p12, %p1548_p3 }
 0x43f   : > { %779 = vadd.xlane.f32.xlu1 %v778_v45 }
 0x497   : > { %v603_v48 = vpop.xlane.xlu1 %602 }
 0x498   : > { %v604_v49 = vsub.f32 %v597_v38, %v603_v48 }
 0x49a   : > { %v605_v51 = vmul.f32 1.442695, %v604_v49 }
 0x49b   : > { %v783_v53 = vpop.permute.xlu1 %782 }
 0x49c   : > { %1447 = vpow2.f32 %v605_v51 }
 0x49d   : > { %1449 = vpow2.f32 %v947_v50 }
 0x4a6   : > { %v1448_v52 = vpop.eup %1447 }
 0x4a7   : > { %1312 = vmatmul.mubr.msk.f32.vlgmr.msra.gmra.mrb[6].mxu1 %vm359_vm2, %v1448_v52  ;;  %v607_v54 = vsel %vm359_vm2, %v1448_v52, 0.0  ;;  %v1450_v55 = vpop.eup %1449 }
 0x4a8   : > { %1320 = vmatpush3.msra.mxu1 %v783_v53  ;;  %608 = vadd.xlane.f32.xlu0 %v607_v54  ;;  %v949_v57 = vsel %vm359_vm2, %v1450_v55, 0.0 }
 0x4a9   : > { %1321 = vmatprep.mubr.msk.f32.mxu1 %vm1623_vm0, %v1624_v1  ;;  %1329 = vmatprep.subr.mxu1 %v1624_v1 }
 0x4ab   : > { %1322 = vmatmul.mubr.msk.f32.vlgmr.msra.gmra.mrb[8].mxu1 %vm359_vm2, %v1446_v44 }
 0x4ac   : > { %1330 = vmatpush3.msra.mxu1 %v954_v56  ;;  %950 = vadd.xlane.f32.xlu0 %v949_v57 }
 0x4ad   : > { %1331 = vmatprep.mubr.msk.f32.mxu1 %vm1623_vm0, %v1624_v1  ;;  %v1352_v1 = vpack.c.bf16 %v1038_v4, %v1037_v3 }
 0x4af   : > { %1332 = vmatmul.mubr.msk.f32.vlgmr.msra.gmra.mrb[10].mxu1 %vm359_vm2, %v1450_v55  ;;  %1353 = vmatpush3.bf16.msra.mxu0 %v1352_v1 }
 0x4b0   : > { %442 = vadd.xlane.f32.xlu0 %v441_v58  ;;  %1354 = vmatprep.subr.bf16.mxu0 %v1622_v0 }
 0x4b3   : > { %1356 = vmatpush3.bf16.msra.mxu0 %v1355_v9 }
 0x4cc   : > { %v780_v2 = vpop.xlane.xlu1 %779 }
 0x535   : > { %v609_v59 = vpop.xlane.xlu0 %608 }
 0x539   : > { %v951_v60 = vpop.xlane.xlu0 %950 }
 0x53d   : > { %v443_v61 = vpop.xlane.xlu0 %442 }
 0x53e   : > { %1451 = vrcp.f32 %v443_v61 }
 0x53f   : > { %1453 = vrcp.f32 %v609_v59 }
 0x540   : > { %1455 = vrcp.f32 %v780_v2 }
 0x541   : > { %1457 = vrcp.f32 %v951_v60 }
 0x548   : > { %v1452_v62 = vpop.eup %1451 }
 0x549   : > { %v521_v63 = vmul.f32 %v1452_v62, %v517_v36  ;;  %v1454_v7 = vpop.eup %1453 }
 0x54a   : > { %v1456_v12 = vpop.eup %1455 }
 0x54b   : > { %522 = vst.msk [vmem:[#allocation2] sm:$0xff] %vm359_vm2, %v521_v63  ;;  %v1458_v16 = vpop.eup %1457 }
 0x57a   : > { %v683_v8 = vpop.f32.mrb[6].mxu1 }
 0x57b   : > { %v687_v10 = vmul.f32 %v1454_v7, %v683_v8  ;;  %v1313_v11 = vpop.f32.mrb[7].mxu1 }
 0x57d   : > { %689 = vrot.lane.b32.xlu0 %v687_v10, %s1636_s17 }
 0x57e   : > { %v854_v13 = vpop.f32.mrb[8].mxu1 }
 0x57f   : > { %v858_v14 = vmul.f32 %v1456_v12, %v854_v13  ;;  %v1323_v15 = vpop.f32.mrb[9].mxu1 }
 0x581   : > { %860 = vrot.lane.b32.xlu1 %v858_v14, %s1637_s24 }
 0x582   : > { %v1025_v17 = vpop.f32.mrb[10].mxu1 }
 0x583   : > { %v1029_v18 = vmul.f32 %v1458_v16, %v1025_v17  ;;  %v1333_v19 = vpop.f32.mrb[11].mxu1 }
 0x585   : > { %1031 = vrot.lane.b32.xlu0 %v1029_v18, %s1638_s26 }
 0x5ef   : > { %v690_v20 = vpop.permute.xlu0 %689 }
 0x5f0   : > { %693 = vst.msk [vmem:[#allocation2] sm:$0xff] %vm692_vm3, %v690_v20 }
 0x5f3   : > { %v861_v0 = vpop.permute.xlu1 %860 }
 0x5f4   : > { %864 = vst.msk [vmem:[#allocation2] sm:$0xff] %vm863_vm4, %v861_v0 }
 0x5f7   : > { %v1032_v21 = vpop.permute.xlu0 %1031 }
 0x5f8   : > { %1035 = vst.msk [vmem:[#allocation2] sm:$0xff] %vm1034_vm5, %v1032_v21 }
 0x5ff   : > { %v1036_v22 = vld [vmem:[#allocation2] sm:$0xff] }
 0x600   : > { %1343 = vmatmul.mubr.msk.f32.vlgmr.msra.gmra.mrb[6].mxu0 %vm281_vm1, %v1036_v22 }
 0x6d3   : > { %v1117_v24 = vpop.f32.mrb[6].mxu0 }
 0x6d4   : > { %v1118_v25 = vadd.f32 %v1251_v23, %v1117_v24  ;;  %v1344_v26 = vpop.f32.mrb[7].mxu0 }
 0x6d6   : > { %1121 = vst.msk [vmem:[%s268_s28] sm:$0xff] %vm281_vm1, %v1118_v25 }
 0x6d7   : > { %1558 = shalt.err (!%p1555_p2)
}
 0x6d8   : > { %s1559_s12 = scalar_lea.hbm %s1931_s15, 128  ;;  %s1563_s26 = scalar_lea.hbm %s1981_s5, 256 }
 0x6d9   : > { %p1560_p13 = scmp.ne.s32.totalorder %s1931_s15, %s1559_s12  ;;  %p1564_p4 = scmp.lt.u32.totalorder %s1931_s15, %s1981_s5 }
 0x6da   : > { %p1565_p5 = scmp.lt.u32.totalorder %s1563_s26, %s1559_s12  ;;  %p1567_p11 = scmp.lt.u32.totalorder %s1559_s12, %s1931_s15 }
 0x6db   : > { %p1561_p6 = pnand %p1560_p13, %p1995_p0 }
 0x6dc   : > { %p1566_p8 = por %p1565_p5, %p1564_p4 }
 0x6dd   : > { %p1562_p10 = pneg %p1561_p6 }
 0x6de   : > { %p1568_p1 = por %p1567_p11, %p1566_p8 }
 0x6e0   : > { %p1569_p3 = pnand %p1568_p1, %p1562_p10 }
 0x6e2   : > { %1572 = shalt.err (!%p1569_p3)
}
 0x6e3   : > { %1367 = dma.vmem_to_hbm [thread:$0]  (%p1995_p0), %s1933_s7, 128, %s1931_s15, %s1123_s16  }
 0x6e4 PF: > { %s1148_s11 = sand.u32 1, %s1603_s18   ;;  %p1996_p7 = scmp.ne.s32.totalorder %s1986_s25, 0 }
 0x6e5   : > { %p1997_p9 = scmp.ge.s32.totalorder %s1615_s21, 2  ;;  %s1149_s28 = scalar_lea.sflag [#allocation5], %s1148_s11 }
 0x6e7   : > { %p1381_p12 = pnand %p1997_p9, %p1996_p7 }
 0x6e9   : > { %1598 = dma.done.wait (!%p1381_p12), %s1149_s28, 128  }
 0x6ea   : > { %1600 = vsyncadd (!%p1381_p12), %s1149_s28, 4294967168  ;;  %p19_p2 = scmp.ge.s32.totalorder %s1780_s14, 4   ;;  %s1998_s18 = smov %s1607_s19 }
 0x6eb   : > { %s1999_s19 = smov %s1611_s20  ;;  %s2000_s20 = smov %s1796_s27 }
 0x6ec   : > { %s2001_s21 = smov %s1780_s14  ;;  %21 = sbr.rel (!%p19_p2) target bundleno = 6 (0x6), region = 93 }
 0x6f3   :  { %1154 = vsyncpa [#allocation4], 1 }
 0x6f4   :  { %1156 = vsyncpa [#allocation4 + $0x1], 1 }
 0x6f5   :  { %1157 = vsyncpa [#allocation7], 1 }
 0x6f6   :  { %1158 = vsyncpa [#allocation5], 1 }
 0x6f7   :  { %1160 = vsyncpa [#allocation5 + $0x1], 1 }

</bundles_post_ra>
